<compile_context>
chip_gen: v5e
topology: v5e:2x2
jax: 0.10.0
libtpu: 0.0.40
codegen_flags: <defaults>
</compile_context>

<pallas_src>
import functools

import jax
import jax.numpy as jnp
from jax import lax
from jax.experimental import pallas as pl
from jax.experimental.pallas import tpu as pltpu

_EPS = 1e-12              # torch.nn.functional.normalize default eps
_EPS_SQ = _EPS * _EPS


def _vmem_capacity_bytes():
    try:
        return int(pltpu.get_tpu_info().vmem_capacity_bytes)
    except Exception:
        return 64 * 1024 * 1024   # conservative fallback (v7x per-TC VMEM)


# ---------------------------------------------------------------------------
# Fused single-pass kernel: whole (TB, C, HW) rows in one block.
# ---------------------------------------------------------------------------
def _fused_kernel(x_ref, out_ref, *, inv_hw):
    # x_ref:   (TB, C, HW)
    # out_ref: (TB, 2, C, HW)  [plane 0 = spatially L2-normed x,
    #                           plane 1 = channel-L2-normed global mean, tiled]
    x = x_ref[...]
    if x.dtype != jnp.float32:
        x = x.astype(jnp.float32)
    eps_sq = jnp.float32(_EPS_SQ)

    # second branch: L2-normalize each channel over the spatial dims
    sp_sumsq = jnp.sum(x * x, axis=-1, keepdims=True)            # (TB, C, 1)
    sb = x * lax.rsqrt(jnp.maximum(sp_sumsq, eps_sq))            # (TB, C, HW)

    # first branch: global average pool -> L2-normalize over channels
    mean_c = jnp.sum(x, axis=-1, keepdims=True) * jnp.float32(inv_hw)   # (TB,C,1)
    ch_sumsq = jnp.sum(mean_c * mean_c, axis=1, keepdims=True)          # (TB,1,1)
    fb = mean_c * lax.rsqrt(jnp.maximum(ch_sumsq, eps_sq))              # (TB,C,1)

    sb4 = sb[:, None, :, :]                                             # (TB,1,C,HW)
    fb4 = jnp.broadcast_to(fb[:, None, :, :], sb4.shape)                # (TB,1,C,HW)
    out_ref[:, 0:1, :, :] = sb4.astype(out_ref.dtype)
    out_ref[:, 1:2, :, :] = fb4.astype(out_ref.dtype)


# ---------------------------------------------------------------------------
# Two-pass path (rows too big for one VMEM block): pass A = reduce over HW
# chunks, pass B = stream x again and write both branches.
# ---------------------------------------------------------------------------
def _reduce_kernel(x_ref, s_ref, ss_ref, *, hw, thw, need_mask):
    # x_ref: (1, C, THW); s_ref/ss_ref: (1, C, 1) f32 accumulators.
    h = pl.program_id(1)
    x = x_ref[...]
    if x.dtype != jnp.float32:
        x = x.astype(jnp.float32)
    if need_mask:
        lane = lax.broadcasted_iota(jnp.int32, x.shape, 2)
        x = jnp.where(h * thw + lane < hw, x, jnp.float32(0.0))
    s = jnp.sum(x, axis=-1, keepdims=True)
    ss = jnp.sum(x * x, axis=-1, keepdims=True)

    @pl.when(h == 0)
    def _():
        s_ref[...] = s
        ss_ref[...] = ss

    @pl.when(h > 0)
    def _():
        s_ref[...] = s_ref[...] + s
        ss_ref[...] = ss_ref[...] + ss


def _write_kernel(x_ref, sscale_ref, fb_ref, out_ref):
    # x_ref: (1, C, THW); sscale/fb: (1, C, 1); out_ref: (1, 2, C, THW)
    x = x_ref[...]
    if x.dtype != jnp.float32:
        x = x.astype(jnp.float32)
    sb = x * sscale_ref[...]                                # broadcast (1,C,1)
    sb4 = sb[:, None, :, :]
    fb4 = jnp.broadcast_to(fb_ref[...][:, None, :, :], sb4.shape)
    out_ref[:, 0:1, :, :] = sb4.astype(out_ref.dtype)
    out_ref[:, 1:2, :, :] = fb4.astype(out_ref.dtype)


# ---------------------------------------------------------------------------
# Wrapper
# ---------------------------------------------------------------------------
def image_pooling(x, *, _force_two_pass=False, _force_thw=None):
    """x: (N, C, H, W) -> (N, 2C, H, W)."""
    N, C, H, W = x.shape
    HW = H * W
    itemsize = jnp.dtype(x.dtype).itemsize
    x3 = x.reshape(N, C, HW)                    # free (contiguous) reshape

    vmem_cap = _vmem_capacity_bytes()
    vmem_limit = int(vmem_cap * 0.8)            # headroom for compiler scratch
    budget = int(vmem_cap * 0.7)                # per-step: 2x-buffered blocks + temps

    # Per-sample footprint of the fused path: double-buffered input (C*HW*isz)
    # + double-buffered output (2*C*HW*isz) + f32 temporaries (~3*C*HW*4).
    # NOTE: if C % 8 != 0 the (8,128) layout padding inflates this; harmless
    # for small C, and typical backbones have C % 8 == 0.
    row_bytes = C * HW * (6 * itemsize + 12)

    if not _force_two_pass and row_bytes <= budget:
        # ------------------------- fused single pass -------------------------
        max_tb = max(1, budget // row_bytes)
        if N >= 2:
            # Keep >= 2 grid steps: enables v7x megacore and, on 1-TC chips,
            # gives DMA/compute overlap (a single grid step has no pipelining).
            max_tb = max(1, min(max_tb, N // 2))
        max_tb = min(max_tb, N)
        tb = 1
        for d in range(1, max_tb + 1):          # largest divisor of N <= max_tb
            if N % d == 0:
                tb = d
        grid = N // tb
        # TODO(synk): for N == 1 on v7x, add a channel-parallel grid axis so the
        # second TensorCore is not idle for batch-1 inference shapes.

        out = pl.pallas_call(
            functools.partial(_fused_kernel, inv_hw=1.0 / HW),
            out_shape=jax.ShapeDtypeStruct((N, 2, C, HW), x.dtype),
            grid_spec=pltpu.PrefetchScalarGridSpec(
                num_scalar_prefetch=0,
                grid=(grid,),
                in_specs=[pl.BlockSpec((tb, C, HW), lambda n: (n, 0, 0))],
                out_specs=pl.BlockSpec((tb, 2, C, HW), lambda n: (n, 0, 0, 0)),
            ),
            compiler_params=pltpu.CompilerParams(
                dimension_semantics=("parallel",),
                vmem_limit_bytes=vmem_limit,
            ),
            cost_estimate=pl.CostEstimate(
                flops=6 * N * C * HW,
                transcendentals=2 * N * C,
                bytes_accessed=3 * N * C * HW * itemsize,
            ),
        )(x3)
        return out.reshape(N, 2 * C, H, W)

    # --------------------------- two-pass path ------------------------------
    # Chunk HW in multiples of 128 (or use the full extent, which is exempt
    # from the 128 rule); the tail chunk is explicitly masked in pass A.
    chunk_bytes_per_lane = max(1, C * (3 * itemsize + 12))
    if _force_thw is not None:
        thw = min(int(_force_thw), HW)
    else:
        thw = max(128, (budget // chunk_bytes_per_lane) // 128 * 128)
        thw = min(thw, HW)
    if thw != HW and (thw % 128) != 0:
        thw = HW
    # TODO(synk): also chunk the channel axis for extreme C where even a single
    # 128-lane-wide chunk exceeds the VMEM budget.
    n_hw = pl.cdiv(HW, thw)
    need_mask = (HW % thw) != 0

    sums_shape = jax.ShapeDtypeStruct((N, C, 1), jnp.float32)
    s_sum, s_sumsq = pl.pallas_call(
        functools.partial(_reduce_kernel, hw=HW, thw=thw, need_mask=need_mask),
        out_shape=(sums_shape, sums_shape),
        grid_spec=pltpu.PrefetchScalarGridSpec(
            num_scalar_prefetch=0,
            grid=(N, n_hw),
            in_specs=[pl.BlockSpec((1, C, thw), lambda n, h: (n, 0, h))],
            out_specs=(pl.BlockSpec((1, C, 1), lambda n, h: (n, 0, 0)),
                       pl.BlockSpec((1, C, 1), lambda n, h: (n, 0, 0))),
        ),
        compiler_params=pltpu.CompilerParams(
            dimension_semantics=("parallel", "arbitrary"),
            vmem_limit_bytes=vmem_limit,
        ),
        cost_estimate=pl.CostEstimate(
            flops=3 * N * C * HW,
            transcendentals=0,
            bytes_accessed=N * C * HW * itemsize,
        ),
    )(x3)

    # Tiny (N, C) finalize math in plain JAX.
    eps_sq = jnp.float32(_EPS_SQ)
    mean_c = s_sum * jnp.float32(1.0 / HW)                              # (N,C,1)
    sscale = lax.rsqrt(jnp.maximum(s_sumsq, eps_sq))                    # (N,C,1)
    ch_sumsq = jnp.sum(mean_c * mean_c, axis=1, keepdims=True)          # (N,1,1)
    fb_val = mean_c * lax.rsqrt(jnp.maximum(ch_sumsq, eps_sq))          # (N,C,1)

    out = pl.pallas_call(
        _write_kernel,
        out_shape=jax.ShapeDtypeStruct((N, 2, C, HW), x.dtype),
        grid_spec=pltpu.PrefetchScalarGridSpec(
            num_scalar_prefetch=0,
            grid=(N, n_hw),
            in_specs=[pl.BlockSpec((1, C, thw), lambda n, h: (n, 0, h)),
                      pl.BlockSpec((1, C, 1), lambda n, h: (n, 0, 0)),
                      pl.BlockSpec((1, C, 1), lambda n, h: (n, 0, 0))],
            out_specs=pl.BlockSpec((1, 2, C, thw), lambda n, h: (n, 0, 0, h)),
        ),
        compiler_params=pltpu.CompilerParams(
            dimension_semantics=("parallel", "parallel"),
            vmem_limit_bytes=vmem_limit,
        ),
        cost_estimate=pl.CostEstimate(
            flops=2 * N * C * HW,
            transcendentals=0,
            bytes_accessed=3 * N * C * HW * itemsize,
        ),
    )(x3, sscale, fb_val)
    return out.reshape(N, 2 * C, H, W)


# ---------------------------------------------------------------------------
# Pure-JAX reference mirroring the PyTorch forward.
# ---------------------------------------------------------------------------
def _reference(x):
    mean_c = jnp.mean(x, axis=(2, 3), keepdims=True)                     # (N,C,1,1)
    ch_norm = jnp.sqrt(jnp.sum(mean_c * mean_c, axis=1, keepdims=True))  # (N,1,1,1)
    fb = mean_c / jnp.maximum(ch_norm, _EPS)
    fb = jnp.broadcast_to(fb, x.shape)
    sp_norm = jnp.sqrt(jnp.sum(x * x, axis=(2, 3), keepdims=True))       # (N,C,1,1)
    sb = x / jnp.maximum(sp_norm, _EPS)
    return jnp.concatenate([sb, fb], axis=1)


if __name__ == "__main__":
    key = jax.random.PRNGKey(0)

    # Main check: 128-aligned spatial extent (16*16 = 256), fused path.
    x = jax.random.normal(key, (2, 4, 16, 16), dtype=jnp.float32)
    out = jax.block_until_ready(image_pooling(x))
    ref = _reference(x)
    assert out.shape == (2, 8, 16, 16), out.shape
    assert jnp.allclose(out, ref, atol=1e-5, rtol=1e-5), "mismatch vs reference"

    # Non-aligned HW (7*7 = 49) and N=3 (divisor TB selection), fused path.
    x2 = jax.random.normal(jax.random.PRNGKey(1), (3, 4, 7, 7), dtype=jnp.float32)
    out2 = jax.block_until_ready(image_pooling(x2))
    ref2 = _reference(x2)
    assert out2.shape == (3, 8, 7, 7), out2.shape
    assert jnp.allclose(out2, ref2, atol=1e-5, rtol=1e-5), "mismatch (non-aligned HW)"

    # Two-pass path exercised at a small shape: HW=169 chunked into 128-wide
    # blocks (accumulation + tail masking + chunked writeback).
    x3 = jax.random.normal(jax.random.PRNGKey(2), (2, 8, 13, 13), dtype=jnp.float32)
    out3 = jax.block_until_ready(
        image_pooling(x3, _force_two_pass=True, _force_thw=128))
    ref3 = _reference(x3)
    assert out3.shape == (2, 16, 13, 13), out3.shape
    assert jnp.allclose(out3, ref3, atol=1e-5, rtol=1e-5), "mismatch (two-pass path)"

    print("KERNEL_OK")
</pallas_src>

<mosaic_0001>
module attributes {stable_mosaic.version = 11 : i64} {
  func.func @_fused_kernel(%arg0: i32, %arg1: memref<1x4x256xf32, #tpu.memory_space<vmem>>, %arg2: memref<1x2x4x256xf32, #tpu.memory_space<vmem>>) attributes {dimension_semantics = [#tpu.dimension_semantics<parallel>], iteration_bounds = array<i64: 2>, scalar_prefetch = 0 : i64, scratch_operands = 0 : i64, tpu.core_type = #tpu.core_type<tc>, window_params = [{transform_indices = @transform_0, window_bounds = array<i64: 1, 4, 256>}, {transform_indices = @transform_1, window_bounds = array<i64: 1, 2, 4, 256>}]} {
    %c0 = arith.constant 0 : index
    %c0_0 = arith.constant 0 : index
    %c0_1 = arith.constant 0 : index
    %0 = vector.load %arg1[%c0, %c0_0, %c0_1] : memref<1x4x256xf32, #tpu.memory_space<vmem>>, vector<1x4x256xf32>
    %1 = arith.mulf %0, %0 : vector<1x4x256xf32>
    %cst = arith.constant dense<0.000000e+00> : vector<1x4xf32>
    %2 = vector.multi_reduction <add>, %1, %cst [2] : vector<1x4x256xf32> to vector<1x4xf32>
    %3 = vector.shape_cast %2 : vector<1x4xf32> to vector<1x4x1xf32>
    %cst_2 = arith.constant 1.000000e-24 : f32
    %4 = vector.broadcast %cst_2 : f32 to vector<1x4x1xf32>
    %5 = arith.maximumf %3, %4 : vector<1x4x1xf32>
    %6 = math.rsqrt %5 : vector<1x4x1xf32>
    %7 = vector.broadcast %6 : vector<1x4x1xf32> to vector<1x4x256xf32>
    %8 = arith.mulf %0, %7 : vector<1x4x256xf32>
    %cst_3 = arith.constant dense<0.000000e+00> : vector<1x4xf32>
    %9 = vector.multi_reduction <add>, %0, %cst_3 [2] : vector<1x4x256xf32> to vector<1x4xf32>
    %10 = vector.shape_cast %9 : vector<1x4xf32> to vector<1x4x1xf32>
    %cst_4 = arith.constant 3.906250e-03 : f32
    %11 = vector.broadcast %cst_4 : f32 to vector<1x4x1xf32>
    %12 = arith.mulf %10, %11 : vector<1x4x1xf32>
    %13 = arith.mulf %12, %12 : vector<1x4x1xf32>
    %cst_5 = arith.constant dense<0.000000e+00> : vector<1x1xf32>
    %14 = vector.multi_reduction <add>, %13, %cst_5 [1] : vector<1x4x1xf32> to vector<1x1xf32>
    %15 = vector.shape_cast %14 : vector<1x1xf32> to vector<1x1x1xf32>
    %cst_6 = arith.constant 1.000000e-24 : f32
    %16 = vector.broadcast %cst_6 : f32 to vector<1x1x1xf32>
    %17 = arith.maximumf %15, %16 : vector<1x1x1xf32>
    %18 = math.rsqrt %17 : vector<1x1x1xf32>
    %19 = vector.broadcast %18 : vector<1x1x1xf32> to vector<1x4x1xf32>
    %20 = arith.mulf %12, %19 : vector<1x4x1xf32>
    %21 = vector.shape_cast %8 : vector<1x4x256xf32> to vector<1x1x4x256xf32>
    %22 = vector.shape_cast %20 : vector<1x4x1xf32> to vector<1x1x4x1xf32>
    %23 = vector.shape_cast %22 : vector<1x1x4x1xf32> to vector<1x1x4x1xf32>
    %24 = vector.broadcast %23 : vector<1x1x4x1xf32> to vector<1x1x4x256xf32>
    %c0_7 = arith.constant 0 : index
    %c0_8 = arith.constant 0 : index
    %c0_9 = arith.constant 0 : index
    %c0_10 = arith.constant 0 : index
    %25 = vector.load %arg2[%c0_7, %c0_8, %c0_9, %c0_10] : memref<1x2x4x256xf32, #tpu.memory_space<vmem>>, vector<1x1x4x256xf32>
    tpu.vector_store %arg2[%c0_7, %c0_8, %c0_9, %c0_10], %21 {strides = array<i32>} : memref<1x2x4x256xf32, #tpu.memory_space<vmem>>, vector<1x1x4x256xf32>,
    %c0_11 = arith.constant 0 : index
    %c1 = arith.constant 1 : index
    %c0_12 = arith.constant 0 : index
    %c0_13 = arith.constant 0 : index
    %26 = vector.load %arg2[%c0_11, %c1, %c0_12, %c0_13] : memref<1x2x4x256xf32, #tpu.memory_space<vmem>>, vector<1x1x4x256xf32>
    tpu.vector_store %arg2[%c0_11, %c1, %c0_12, %c0_13], %24 {strides = array<i32>} : memref<1x2x4x256xf32, #tpu.memory_space<vmem>>, vector<1x1x4x256xf32>,
    return
  }
  func.func @transform_0(%arg0: i32) -> (i32, i32, i32) {
    %c0_i32 = arith.constant 0 : i32
    %c0_i32_0 = arith.constant 0 : i32
    %c0_i32_1 = arith.constant 0 : i32
    return %arg0, %c0_i32, %c0_i32_0 : i32, i32, i32
  }
  func.func @transform_1(%arg0: i32) -> (i32, i32, i32, i32) {
    %c0_i32 = arith.constant 0 : i32
    %c0_i32_0 = arith.constant 0 : i32
    %c0_i32_1 = arith.constant 0 : i32
    %c0_i32_2 = arith.constant 0 : i32
    return %arg0, %c0_i32, %c0_i32_0, %c0_i32_1 : i32, i32, i32, i32
  }
}

</mosaic_0001>

<bundles_post_ra>
// kernel: tpu_custom_call.1
= control target key start
LH: loop header
LB: loop body
LE: loop exit
PB: predicated region body
PF: predicated region fallthrough
CT: control target
= control target key end

     0   :  { %6 = vsyncpa [#allocation3], 0  ;;  %s606_s0 = inlined_call_operand.hbm [shape: f32[2,4,256], index: 0, kind: input, shape index: {}]   ;;  %s607_s1 = inlined_call_operand.hbm [shape: f32[2,2,4,256], index: 1, kind: output, shape index: {}]  }
   0x1   :  { %8 = vsyncpa [#allocation3 + $0x1], 0 }
   0x2   :  { %9 = vsyncpa [#allocation4], 0 }
   0x3   :  { %11 = vsyncpa [#allocation4 + $0x1], 0  ;;  %s478_s6 = smov 0   ;;  %s480_s7 = smov 0  }
   0x4   :  { %s482_s8 = smov 0   ;;  %s484_s9 = smov 0  }
   0x5 LB: > { %s499_s10 = sadd.s32 4294967295, %s463_s9   ;;  %s297_s11 = sadd.s32 4294967294, %s463_s9   ;;  %s463_s9 = sphi %s484_s9, %s617_s9   ;;  %s459_s8 = sphi %s482_s8, %s616_s8   ;;  %s455_s7 = sphi %s480_s7, %s615_s7   ;;  %s451_s6 = sphi %s478_s6, %s614_s6  }
   0x6   : > { %s503_s12 = sadd.s32 1, %s463_s9   ;;  %s24_s13 = sadd.s32 1, %s459_s8 }
   0x7   : > { %s21_s14 = ssub.s32 %s463_s9, %s503_s12  ;;  %p31_p0 = scmp.ne.s32.totalorder %s459_s8, %s455_s7 }
   0x8   : > { %p22_p1 = scmp.eq.s32.totalorder %s21_s14, 0  ;;  %p32_p2 = scmp.eq.s32.totalorder %s463_s9, 0 }
   0x9   : > { %p37_p3 = scmp.ne.s32.totalorder %s455_s7, %s451_s6  ;;  %p38_p4 = scmp.eq.s32.totalorder %s499_s10, 0 }
   0xa   : > { %s515_s15 = scalar_select %p22_p1, %s459_s8, %s24_s13  }
   0xb   : > { %p517_p5 = por %p32_p2, %p31_p0  ;;  %p521_p6 = por %p38_p4, %p37_p3 }
   0xc   : > { %p61_p7 = scmp.eq.s32.totalorder %s499_s10, 1  ;;  %p67_p8 = scmp.eq.s32.totalorder %s297_s11, 1 }
   0xd   : > { %p326_p10 = scmp.lt.s32.totalorder %s463_s9, 2  ;;  %s87_s20 = sand.u32 1, %s459_s8  }
   0xe   : > { %p528_p11 = por %p61_p7, %p31_p0  ;;  %p532_p12 = por %p67_p8, %p37_p3 }
   0xf   : > { %s312_s21 = sshll.u32 %s463_s9, 3  ;;  %s300_s22 = sshll.u32 %s87_s20, 3 }
  0x10   : > { %s96_s25 = scalar_lea.hbm %s606_s0, %s312_s21  ;;  %s91_s27 = scalar_lea.vmem [#allocation2], %s300_s22 }
  0x11   : > { %s98_s26 = sshll.u32 %s96_s25, 4  ;;  %s100_s28 = sshll.u32 %s91_s27, 4  ;;  %s99_s26 = int_to_ptr.hbm [resolvable:$true] %s98_s26  ;;  %s101_s28 = int_to_ptr.vmem [resolvable:$true] %s100_s28 }
  0x12   : > { %p543_p13 = pnand %p326_p10, %p517_p5  ;;  %p303_p0 = scmp.ge.s32.totalorder %s463_s9, 1 }
  0x13   : > { %p105_p1 = scmp.lt.s32.totalorder %s463_s9, 3  ;;  %s88_s30 = scalar_lea.sflag [#allocation3], %s87_s20 }
  0x14   : > { %s367_s2 = sshra.s32 %s99_s26, 4  ;;  %p371_p3 = pneg %p543_p13  ;;  %s368_s2 = int_to_ptr.hbm [resolvable:$true] %s367_s2 }
  0x15   : > { %s369_s3 = scalar_lea.hbm %s368_s2, 8  ;;  %s374_s11 = scalar_lea.hbm %s606_s0, 16 }
  0x16   : > { %p370_p2 = scmp.ne.s32.totalorder %s368_s2, %s369_s3  ;;  %p375_p5 = scmp.lt.s32.totalorder %s368_s2, %s606_s0 }
  0x17   : > { %p376_p8 = scmp.lt.s32.totalorder %s374_s11, %s369_s3 }
  0x18   : > { %p372_p4 = pnand %p371_p3, %p370_p2 }
  0x19   : > { %p377_p10 = por %p376_p8, %p375_p5 }
  0x1a   : > { %p373_p7 = pneg %p372_p4 }
  0x1c   : > { %p378_p9 = pnand %p377_p10, %p373_p7 }
  0x1e   : > { %381 = shalt.err (!%p378_p9)
}
  0x1f   : > { %321 = dma.hbm_to_vmem [thread:$0]  (!%p543_p13), %s99_s26, 128, %s101_s28, %s88_s30  }
  0x20   : > { %p106_p2 = pnand %p303_p0, %p105_p1 }
  0x21   : > { %s564_s16 = sand.u32 (!%p106_p2), 1, %s455_s7  }
  0x22   : > { %109 = sbr.rel (%p106_p2) target bundleno = 223 (0xdf), region = 24  ;;  %s304_s20 = sshll.u32 (!%p106_p2), %s564_s16, 3 }
  0x23   : > { %s112_s21 = scalar_lea.sflag (!%p106_p2), [#allocation3], %s564_s16  ;;  %s115_s22 = scalar_lea.vmem (!%p106_p2), [#allocation2], %s304_s20 }
  0x27   : > { %442 = dma.done.wait (%p521_p6), %s112_s21, 128  }
  0x28   : > { %444 = vsyncadd (%p521_p6), %s112_s21, 4294967168  ;;  %v135_v0 = vld [vmem:[%s115_s22] sm:$0xff]  ;;  %vm143_vm0 = vcmask 1043456   ;;  %v465_v28 = vmov 839922192   ;;  %s305_s17 = sshll.u32 %s564_s16, 4 }
  0x29   : > { %v136_v1 = vmul.f32 %v135_v0, %v135_v0  ;;  %v162_v29 = vunpack.c.l.s4 %v465_v28  ;;  %s313_s23 = sshll.u32 %s499_s10, 4  ;;  %s134_s24 = scalar_lea.vmem [#allocation5], %s305_s17 }
  0x2a   : > { %s220_s27 = scalar_lea.hbm %s607_s1, %s313_s23  ;;  %s221_s28 = sshll.u32 %s134_s24, 4  ;;  %s222_s28 = int_to_ptr.vmem [resolvable:$true] %s221_s28 }
  0x2b   : > { %138 = vst [vmem:[#allocation1] ss:$2 sm:$0xff] %v136_v1  ;;  %v163_v32 = vunpack.c.0.s8 %v162_v29  ;;  %s223_s29 = sshll.u32 %s220_s27, 4  ;;  %s209_s10 = scalar_lea.sflag [#allocation4], %s564_s16  ;;  %s224_s29 = int_to_ptr.hbm [resolvable:$true] %s223_s29 }
  0x2c   : > { %s411_s30 = sshra.s32 %s224_s29, 4  ;;  %s417_s5 = scalar_lea.hbm %s607_s1, 32  ;;  %s412_s30 = int_to_ptr.hbm [resolvable:$true] %s411_s30 }
  0x2d   : > { %s413_s2 = scalar_lea.hbm %s412_s30, 16  ;;  %p418_p0 = scmp.lt.s32.totalorder %s412_s30, %s607_s1 }
  0x2e   : > { %p414_p6 = scmp.ne.s32.totalorder %s412_s30, %s413_s2  ;;  %p419_p1 = scmp.lt.s32.totalorder %s417_s5, %s413_s2 }
  0x30   : > { %p415_p9 = pnand %p414_p6, %p528_p11  ;;  %p420_p3 = por %p419_p1, %p418_p0 }
  0x32   : > { %v139_v2 = vld.sshfl [vmem:[#allocation1] sm:$0xff pattern:$0x75316420]  ;;  %v140_v3 = vld.sshfl [vmem:[#allocation1 + $0x8] sm:$0xff pattern:$0x75316420]  ;;  %p416_p13 = pneg %p415_p9 }
  0x33   : > { %168 = vst [vmem:[#allocation1] ss:$2 sm:$0xff] %v135_v0  ;;  %v144_v9 = vsel %vm143_vm0, %v139_v2, 0.0  ;;  %v145_v10 = vsel %vm143_vm0, %v140_v3, 0.0 }
  0x34   : > { %v146_v11 = vadd.f32 %v145_v10, %v144_v9  ;;  %p421_p4 = pnand %p420_p3, %p416_p13 }
  0x3a   : > { %v169_v4 = vld.sshfl [vmem:[#allocation1] sm:$0xff pattern:$0x75316420]  ;;  %v170_v5 = vld.sshfl [vmem:[#allocation1 + $0x8] sm:$0xff pattern:$0x75316420] }
  0x3b   : > { %v173_v6 = vsel %vm143_vm0, %v169_v4, 0.0  ;;  %v174_v7 = vsel %vm143_vm0, %v170_v5, 0.0 }
  0x3c   : > { %v175_v8 = vadd.f32 %v174_v7, %v173_v6 }
  0x3e   : > { %176 = vadd.xlane.f32.xlu0 %v175_v8 }
  0x46   : > { %147 = vadd.xlane.f32.xlu0 %v146_v11 }
  0xb1   : > { %v177_v12 = vpop.xlane.xlu0 %176 }
  0xb2   : > { %v178_v13 = vmul.f32 0.00390625, %v177_v12 }
  0xb4   : > { %v179_v14 = vmul.f32 %v178_v13, %v178_v13 }
  0xb6   : > { %v180_v15 = vsel %vm143_vm0, %v179_v14, 0.0 }
  0xb7   : > { %v181_v16 = vrot.slane %v180_v15, 4 }
  0xb9   : > { %v182_v17 = vadd.f32 %v181_v16, %v180_v15  ;;  %v148_v18 = vpop.xlane.xlu0 %147 }
  0xba   : > { %v149_v19 = vmax.f32 %v148_v18, 1e-24 }
  0xbb   : > { %v183_v20 = vrot.slane %v182_v17, 2 }
  0xbc   : > { %363 = vrsqrt.f32 %v149_v19  ;;  %vm156_vm1 = vweird.f32 %v149_v19 }
  0xbd   : > { %v184_v21 = vadd.f32 %v183_v20, %v182_v17 }
  0xbf   : > { %v185_v22 = vrot.slane %v184_v21, 1 }
  0xc1   : > { %v186_v23 = vadd.f32 %v185_v22, %v184_v21 }
  0xc2   : > { %v364_v24 = vpop.eup %363 }
  0xc3   : > { %v187_v25 = vmax.f32 %v186_v23, 1e-24  ;;  %v151_v26 = vmul.f32 %v364_v24, %v149_v19  ;;  %vm157_vm2 = vweird.f32 %v364_v24 }
  0xc4   : > { %vm158_vm3 = vmor %vm156_vm1, %vm157_vm2 }
  0xc5   : > { %365 = vrsqrt.f32 %v187_v25  ;;  %v152_v27 = vmul.f32 %v364_v24, %v151_v26  ;;  %vm194_vm5 = vweird.f32 %v187_v25 }
  0xc7   : > { %v153_v30 = vmul.f32 0.5, %v152_v27 }
  0xc9   : > { %v154_v31 = vsub.f32 1.5, %v153_v30 }
  0xcb   : > { %v366_v33 = vpop.eup %365  ;;  %v155_v34 = vmul.f32 %v364_v24, %v154_v31 }
  0xcc   : > { %v189_v35 = vmul.f32 %v366_v33, %v187_v25  ;;  %vm195_vm4 = vweird.f32 %v366_v33 }
  0xcd   : > { %v159_v36 = vsel %vm158_vm3, %v364_v24, %v155_v34  ;;  %vm196_vm6 = vmor %vm194_vm5, %vm195_vm4 }
  0xce   : > { %v190_v37 = vmul.f32 %v366_v33, %v189_v35  ;;  %v164_v38 = vperm.slane %v159_v36, %v163_v32 }
  0xd0   : > { %v191_v39 = vmul.f32 0.5, %v190_v37  ;;  %v166_v40 = vmul.f32 %v164_v38, %v135_v0 }
  0xd2   : > { %v192_v41 = vsub.f32 1.5, %v191_v39  ;;  %199 = vst [vmem:[%s134_s24] sm:$0xff] %v166_v40 }
  0xd4   : > { %v193_v42 = vmul.f32 %v366_v33, %v192_v41 }
  0xd6   : > { %v197_v43 = vsel %vm196_vm6, %v366_v33, %v193_v42 }
  0xd7   : > { %v198_v44 = vmul.f32 %v197_v43, %v178_v13 }
  0xd9   : > { %v204_v45 = vperm.slane %v198_v44, %v163_v32 }
  0xdb   : > { %306 = vst [vmem:[%s134_s24 + $0x8] sm:$0xff] %v204_v45 }
  0xdc   : > { %424 = shalt.err (!%p421_p4)
}
  0xdd   : > { %s466_s14 = smov 128   ;;  %s467_s16 = smov 8  }
  0xde   : > { %316 = dma.vmem_to_hbm [thread:$0]  (%p528_p11), %s222_s28, 256, %s224_s29, %s209_s10, %s466_s14, %s466_s14, %s467_s16  }
  0xdf PF: > { %s238_s20 = sand.u32 1, %s451_s6   ;;  %p613_p7 = scmp.ge.s32.totalorder %s463_s9, 2 }
  0xe0   : > { %s239_s21 = scalar_lea.sflag [#allocation4], %s238_s20 }
  0xe1   : > { %p323_p5 = pnand %p613_p7, %p532_p12 }
  0xe3   : > { %p324_p8 = pneg %p323_p5 }
  0xe5   : > { %446 = dma.done.wait (%p324_p8), %s239_s21, 256  }
  0xe6   : > { %448 = vsyncadd (%p324_p8), %s239_s21, 4294967040  ;;  %p14_p10 = scmp.ge.s32.totalorder %s503_s12, 4   ;;  %s614_s6 = smov %s455_s7 }
  0xe7   : > { %s615_s7 = smov %s459_s8  ;;  %s616_s8 = smov %s515_s15 }
  0xe8   : > { %s617_s9 = smov %s503_s12  ;;  %16 = sbr.rel (!%p14_p10) target bundleno = 5 (0x5), region = 70 }
  0xed   :  { %245 = vsyncpa [#allocation3], 1 }
  0xee   :  { %247 = vsyncpa [#allocation3 + $0x1], 1 }
  0xef   :  { %248 = vsyncpa [#allocation4], 1 }
  0xf0   :  { %250 = vsyncpa [#allocation4 + $0x1], 1 }

</bundles_post_ra>
